<compile_context>
chip_gen: v6e
topology: v6e:2x2x1
jax: 0.10.0
libtpu: 0.0.40
codegen_flags: <defaults>
</compile_context>

<pallas_src>
import functools

import jax
import jax.numpy as jnp
from jax.experimental import pallas as pl
from jax.experimental.pallas import tpu as pltpu


_VMEM_BLOCK_BUDGET = 24 << 20   # budget for the double-buffered x/out blocks (bytes)
_VMEM_LIMIT_BYTES = 48 << 20    # explicit scoped-VMEM cap; safe on v5e/v6e/v7x


# ---------------------------------------------------------------------------
# Fused fast path: the whole (BB, C, HW) plane is resident per grid step.
# ---------------------------------------------------------------------------
def _se_fused_kernel(x_ref, w1t_ref, b1_ref, w2t_ref, b2_ref, o_ref):
    # x_ref: (BB, C, HW); w1t: (C, Cr); b1: (1, Cr); w2t: (Cr, C); b2: (1, C)
    x = x_ref[...].astype(jnp.float32)                                   # (BB, C, HW)
    squeeze = jnp.mean(x, axis=-1)                                       # (BB, C)
    h = jnp.dot(squeeze, w1t_ref[...],
                preferred_element_type=jnp.float32) + b1_ref[...]        # (BB, Cr)
    h = jnp.maximum(h, 0.0)
    e = jnp.dot(h, w2t_ref[...],
                preferred_element_type=jnp.float32) + b2_ref[...]        # (BB, C)
    e = jax.nn.sigmoid(e)
    o_ref[...] = (x * e[:, :, None]).astype(o_ref.dtype)


# ---------------------------------------------------------------------------
# Large-HW fallback, pass 1: tiled reduction over HW + FCs -> per-(b, c) gate.
# ---------------------------------------------------------------------------
def _se_gate_kernel(x_ref, w1t_ref, b1_ref, w2t_ref, b2_ref, g_ref, acc_ref,
                    *, inv_hw):
    h_idx = pl.program_id(1)

    @pl.when(h_idx == 0)
    def _():
        acc_ref[...] = jnp.zeros_like(acc_ref)

    x = x_ref[...].astype(jnp.float32)                                   # (BB, C, THW)
    acc_ref[...] += jnp.sum(x, axis=-1)                                  # (BB, C)

    @pl.when(h_idx == pl.num_programs(1) - 1)
    def _():
        squeeze = acc_ref[...] * inv_hw                                  # (BB, C)
        h = jnp.dot(squeeze, w1t_ref[...],
                    preferred_element_type=jnp.float32) + b1_ref[...]
        h = jnp.maximum(h, 0.0)
        e = jax.nn.sigmoid(jnp.dot(h, w2t_ref[...],
                                   preferred_element_type=jnp.float32) + b2_ref[...])
        g_ref[...] = e[:, :, None].astype(g_ref.dtype)                   # (BB, C, 1)


# ---------------------------------------------------------------------------
# Large-HW fallback, pass 2: apply the gate while streaming x in lane tiles.
# ---------------------------------------------------------------------------
def _se_scale_kernel(x_ref, g_ref, o_ref):
    x = x_ref[...].astype(jnp.float32)                                   # (BB, C, THW)
    o_ref[...] = (x * g_ref[...]).astype(o_ref.dtype)                    # gate (BB, C, 1)


# ---------------------------------------------------------------------------
# Block-size selection helpers
# ---------------------------------------------------------------------------
def _pick_block_batch(B, per_batch_bytes):
    """Largest divisor of B that (a) keeps >= 2 grid steps along the 'parallel'
    batch axis when B >= 2 (so both v7x TensorCores get work), (b) is <= 8, and
    (c) keeps the double-buffered in+out blocks inside the VMEM budget."""
    cap = max(1, min(8, B // 2)) if B >= 2 else 1
    cap = min(cap, max(1, _VMEM_BLOCK_BUDGET // max(1, 4 * per_batch_bytes)))
    bb = 1
    for d in range(1, cap + 1):
        if B % d == 0:
            bb = d
    return bb


def _pick_hw_tile(HW, C, itemsize):
    """Largest multiple-of-128 divisor of HW whose double-buffered blocks fit
    the VMEM budget (per batch row)."""
    best = None
    d = 128
    while d <= HW:
        if HW % d == 0 and 4 * C * d * itemsize <= _VMEM_BLOCK_BUDGET:
            best = d
        d += 128
    return best if best is not None else HW


# ---------------------------------------------------------------------------
# Public wrapper
# ---------------------------------------------------------------------------
def squeeze_excitation(x, w1, b1, w2, b2, *, force_tiled=False, hw_tile=None):
    """SqueezeExcitation forward.
    x: (B, C, H, W) NCHW (f32 or bf16; compute is f32 internally).
    w1: (Cr, C), b1: (Cr,)  -- fc1 (1x1 conv) weight/bias
    w2: (C, Cr), b2: (C,)   -- fc2 (1x1 conv) weight/bias
    """
    B, C, H, W = x.shape
    HW = H * W
    Cr = w1.shape[0]
    itemsize = jnp.dtype(x.dtype).itemsize

    x3 = x.reshape(B, C, HW)
    w1t = jnp.transpose(w1)             # (C, Cr)  -- (in, out) for the kernel
    w2t = jnp.transpose(w2)             # (Cr, C)
    b1_2d = b1.reshape(1, Cr)
    b2_2d = b2.reshape(1, C)

    fits_fused = 4 * C * HW * itemsize <= _VMEM_BLOCK_BUDGET
    make_params = functools.partial(pltpu.CompilerParams,
                                    vmem_limit_bytes=_VMEM_LIMIT_BYTES)

    if fits_fused and not force_tiled:
        bb = _pick_block_batch(B, C * HW * itemsize)
        cost = pl.CostEstimate(
            flops=2 * B * C * HW + 4 * B * C * Cr,
            transcendentals=B * C,
            bytes_accessed=2 * B * C * HW * itemsize + 4 * (2 * C * Cr + C + Cr),
        )
        out3 = pl.pallas_call(
            _se_fused_kernel,
            out_shape=jax.ShapeDtypeStruct((B, C, HW), x.dtype),
            grid_spec=pltpu.PrefetchScalarGridSpec(
                num_scalar_prefetch=0,
                grid=(B // bb,),
                in_specs=[
                    pl.BlockSpec((bb, C, HW), lambda b: (b, 0, 0)),
                    pl.BlockSpec((C, Cr), lambda b: (0, 0)),
                    pl.BlockSpec((1, Cr), lambda b: (0, 0)),
                    pl.BlockSpec((Cr, C), lambda b: (0, 0)),
                    pl.BlockSpec((1, C), lambda b: (0, 0)),
                ],
                out_specs=pl.BlockSpec((bb, C, HW), lambda b: (b, 0, 0)),
            ),
            compiler_params=make_params(dimension_semantics=("parallel",)),
            cost_estimate=cost,
        )(x3, w1t, b1_2d, w2t, b2_2d)
        return out3.reshape(B, C, H, W)

    # ------------------------------------------------------------------
    # Large-HW fallback (keeps v7x's 64 MiB VMEM safe): two passes over HW.
    # ------------------------------------------------------------------
    thw = hw_tile if hw_tile is not None else _pick_hw_tile(HW, C, itemsize)
    assert HW % thw == 0, "hw_tile must divide H*W"
    bb = _pick_block_batch(B, C * thw * itemsize)
    n_hw = HW // thw

    gate = pl.pallas_call(
        functools.partial(_se_gate_kernel, inv_hw=1.0 / float(HW)),
        out_shape=jax.ShapeDtypeStruct((B, C, 1), jnp.float32),
        grid_spec=pltpu.PrefetchScalarGridSpec(
            num_scalar_prefetch=0,
            grid=(B // bb, n_hw),
            in_specs=[
                pl.BlockSpec((bb, C, thw), lambda b, h: (b, 0, h)),
                pl.BlockSpec((C, Cr), lambda b, h: (0, 0)),
                pl.BlockSpec((1, Cr), lambda b, h: (0, 0)),
                pl.BlockSpec((Cr, C), lambda b, h: (0, 0)),
                pl.BlockSpec((1, C), lambda b, h: (0, 0)),
            ],
            out_specs=pl.BlockSpec((bb, C, 1), lambda b, h: (b, 0, 0)),
            scratch_shapes=[pltpu.VMEM((bb, C), jnp.float32)],
        ),
        compiler_params=make_params(dimension_semantics=("parallel", "arbitrary")),
        cost_estimate=pl.CostEstimate(
            flops=B * C * HW + 4 * B * C * Cr,
            transcendentals=B * C,
            bytes_accessed=B * C * HW * itemsize + 4 * B * C,
        ),
    )(x3, w1t, b1_2d, w2t, b2_2d)

    out3 = pl.pallas_call(
        _se_scale_kernel,
        out_shape=jax.ShapeDtypeStruct((B, C, HW), x.dtype),
        grid_spec=pltpu.PrefetchScalarGridSpec(
            num_scalar_prefetch=0,
            grid=(B // bb, n_hw),
            in_specs=[
                pl.BlockSpec((bb, C, thw), lambda b, h: (b, 0, h)),
                pl.BlockSpec((bb, C, 1), lambda b, h: (b, 0, 0)),
            ],
            out_specs=pl.BlockSpec((bb, C, thw), lambda b, h: (b, 0, h)),
        ),
        compiler_params=make_params(dimension_semantics=("parallel", "parallel")),
        cost_estimate=pl.CostEstimate(
            flops=B * C * HW,
            transcendentals=0,
            bytes_accessed=2 * B * C * HW * itemsize + 4 * B * C,
        ),
    )(x3, gate)
    return out3.reshape(B, C, H, W)


def _reference(x, w1, b1, w2, b2):
    # pure-JAX reference mirroring the PyTorch forward
    squeeze = jnp.mean(x.astype(jnp.float32), axis=(2, 3))          # (B, C)
    h = jnp.maximum(squeeze @ w1.T + b1, 0.0)                       # (B, Cr)
    e = jax.nn.sigmoid(h @ w2.T + b2)                               # (B, C)
    return x.astype(jnp.float32) * e[:, :, None, None]


if __name__ == "__main__":
    def _init(key, B, C, H, W, reduction):
        Cr = max(1, C // reduction)
        kx, k1, k2, k3, k4 = jax.random.split(key, 5)
        x = jax.random.normal(kx, (B, C, H, W), dtype=jnp.float32)
        # Conv2d(kernel_size=1)-style init: U(-1/sqrt(fan_in), 1/sqrt(fan_in))
        bound1 = 1.0 / jnp.sqrt(jnp.float32(C))
        w1 = jax.random.uniform(k1, (Cr, C), jnp.float32, -bound1, bound1)
        b1 = jax.random.uniform(k2, (Cr,), jnp.float32, -bound1, bound1)
        bound2 = 1.0 / jnp.sqrt(jnp.float32(Cr))
        w2 = jax.random.uniform(k3, (C, Cr), jnp.float32, -bound2, bound2)
        b2 = jax.random.uniform(k4, (C,), jnp.float32, -bound2, bound2)
        return x, w1, b1, w2, b2

    key = jax.random.PRNGKey(0)
    key_a, key_b = jax.random.split(key)

    # Config 1: module's nominal small config (B=2 keeps two 'parallel' grid
    # steps -> both v7x TensorCores busy).  in_channels=64, reduction=16.
    x, w1, b1, w2, b2 = _init(key_a, B=2, C=64, H=16, W=16, reduction=16)
    out = jax.block_until_ready(squeeze_excitation(x, w1, b1, w2, b2))
    ref = _reference(x, w1, b1, w2, b2)
    assert out.shape == x.shape
    assert jnp.allclose(out, ref, atol=1e-5, rtol=1e-5), "fused path mismatch"

    # Config 2: larger batch exercises the BB>1 batched blocks (BB=4, grid=(2,)).
    x8, w1b, b1b, w2b, b2b = _init(key_b, B=8, C=64, H=16, W=16, reduction=16)
    out8 = jax.block_until_ready(squeeze_excitation(x8, w1b, b1b, w2b, b2b))
    ref8 = _reference(x8, w1b, b1b, w2b, b2b)
    assert jnp.allclose(out8, ref8, atol=1e-5, rtol=1e-5), "batched fused path mismatch"

    # Config 3: force the large-HW tiled fallback (HW split into 128-lane tiles)
    # so the VMEM-safe path is also compiled, run and checked.
    out_t = jax.block_until_ready(
        squeeze_excitation(x, w1, b1, w2, b2, force_tiled=True, hw_tile=128))
    assert jnp.allclose(out_t, ref, atol=1e-5, rtol=1e-5), "tiled fallback mismatch"

    print("KERNEL_OK")
</pallas_src>

<mosaic_0001>
module attributes {stable_mosaic.version = 11 : i64} {
  func.func @_se_fused_kernel(%arg0: i32, %arg1: memref<1x64x256xf32, #tpu.memory_space<vmem>>, %arg2: memref<64x4xf32, #tpu.memory_space<vmem>>, %arg3: memref<1x4xf32, #tpu.memory_space<vmem>>, %arg4: memref<4x64xf32, #tpu.memory_space<vmem>>, %arg5: memref<1x64xf32, #tpu.memory_space<vmem>>, %arg6: memref<1x64x256xf32, #tpu.memory_space<vmem>>) attributes {dimension_semantics = [#tpu.dimension_semantics<parallel>], iteration_bounds = array<i64: 2>, scalar_prefetch = 0 : i64, scratch_operands = 0 : i64, tpu.core_type = #tpu.core_type<tc>, window_params = [{transform_indices = @transform_0, window_bounds = array<i64: 1, 64, 256>}, {pipeline_mode = #tpu.pipeline_mode<synchronous>, transform_indices = @transform_1, window_bounds = array<i64: 64, 4>}, {pipeline_mode = #tpu.pipeline_mode<synchronous>, transform_indices = @transform_2, window_bounds = array<i64: 1, 4>}, {pipeline_mode = #tpu.pipeline_mode<synchronous>, transform_indices = @transform_3, window_bounds = array<i64: 4, 64>}, {pipeline_mode = #tpu.pipeline_mode<synchronous>, transform_indices = @transform_4, window_bounds = array<i64: 1, 64>}, {transform_indices = @transform_5, window_bounds = array<i64: 1, 64, 256>}]} {
    %c0 = arith.constant 0 : index
    %c0_0 = arith.constant 0 : index
    %c0_1 = arith.constant 0 : index
    %0 = vector.load %arg1[%c0, %c0_0, %c0_1] : memref<1x64x256xf32, #tpu.memory_space<vmem>>, vector<1x64x256xf32>
    %cst = arith.constant dense<0.000000e+00> : vector<1x64xf32>
    %1 = vector.multi_reduction <add>, %0, %cst [2] : vector<1x64x256xf32> to vector<1x64xf32>
    %cst_2 = arith.constant 2.560000e+02 : f32
    %2 = vector.broadcast %cst_2 : f32 to vector<1x64xf32>
    %3 = arith.divf %1, %2 : vector<1x64xf32>
    %c0_3 = arith.constant 0 : index
    %c0_4 = arith.constant 0 : index
    %4 = vector.load %arg2[%c0_3, %c0_4] : memref<64x4xf32, #tpu.memory_space<vmem>>, vector<64x4xf32>
    %cst_5 = arith.constant dense<0.000000e+00> : vector<1x4xf32>
    %5 = tpu.matmul %3, %4, %cst_5 {dimension_numbers = #tpu.dot_dimension_numbers<[1], [0], [0], [1], [0, 0, 1, 1], [], []>} : vector<1x64xf32>, vector<64x4xf32>, vector<1x4xf32> -> vector<1x4xf32>
    %c0_6 = arith.constant 0 : index
    %c0_7 = arith.constant 0 : index
    %6 = vector.load %arg3[%c0_6, %c0_7] : memref<1x4xf32, #tpu.memory_space<vmem>>, vector<1x4xf32>
    %7 = arith.addf %5, %6 : vector<1x4xf32>
    %cst_8 = arith.constant 0.000000e+00 : f32
    %8 = vector.broadcast %cst_8 : f32 to vector<1x4xf32>
    %9 = arith.maximumf %7, %8 : vector<1x4xf32>
    %c0_9 = arith.constant 0 : index
    %c0_10 = arith.constant 0 : index
    %10 = vector.load %arg4[%c0_9, %c0_10] : memref<4x64xf32, #tpu.memory_space<vmem>>, vector<4x64xf32>
    %cst_11 = arith.constant dense<0.000000e+00> : vector<1x64xf32>
    %11 = tpu.matmul %9, %10, %cst_11 {dimension_numbers = #tpu.dot_dimension_numbers<[1], [0], [0], [1], [0, 0, 1, 1], [], []>} : vector<1x4xf32>, vector<4x64xf32>, vector<1x64xf32> -> vector<1x64xf32>
    %c0_12 = arith.constant 0 : index
    %c0_13 = arith.constant 0 : index
    %12 = vector.load %arg5[%c0_12, %c0_13] : memref<1x64xf32, #tpu.memory_space<vmem>>, vector<1x64xf32>
    %13 = arith.addf %11, %12 : vector<1x64xf32>
    %14 = arith.negf %13 : vector<1x64xf32>
    %15 = math.exp %14 : vector<1x64xf32>
    %cst_14 = arith.constant 1.000000e+00 : f32
    %16 = vector.broadcast %cst_14 : f32 to vector<1x64xf32>
    %17 = arith.addf %16, %15 : vector<1x64xf32>
    %18 = arith.divf %16, %17 : vector<1x64xf32>
    %19 = vector.shape_cast %18 : vector<1x64xf32> to vector<1x64x1xf32>
    %20 = vector.broadcast %19 : vector<1x64x1xf32> to vector<1x64x256xf32>
    %21 = arith.mulf %0, %20 : vector<1x64x256xf32>
    %c0_15 = arith.constant 0 : index
    %c0_16 = arith.constant 0 : index
    %c0_17 = arith.constant 0 : index
    %22 = vector.load %arg6[%c0_15, %c0_16, %c0_17] : memref<1x64x256xf32, #tpu.memory_space<vmem>>, vector<1x64x256xf32>
    tpu.vector_store %arg6[%c0_15, %c0_16, %c0_17], %21 {strides = array<i32>} : memref<1x64x256xf32, #tpu.memory_space<vmem>>, vector<1x64x256xf32>,
    return
  }
  func.func @transform_0(%arg0: i32) -> (i32, i32, i32) {
    %c0_i32 = arith.constant 0 : i32
    %c0_i32_0 = arith.constant 0 : i32
    %c0_i32_1 = arith.constant 0 : i32
    return %arg0, %c0_i32, %c0_i32_0 : i32, i32, i32
  }
  func.func @transform_1(%arg0: i32) -> (i32, i32) {
    %c0_i32 = arith.constant 0 : i32
    %c0_i32_0 = arith.constant 0 : i32
    %c0_i32_1 = arith.constant 0 : i32
    return %c0_i32, %c0_i32_0 : i32, i32
  }
  func.func @transform_2(%arg0: i32) -> (i32, i32) {
    %c0_i32 = arith.constant 0 : i32
    %c0_i32_0 = arith.constant 0 : i32
    %c0_i32_1 = arith.constant 0 : i32
    return %c0_i32, %c0_i32_0 : i32, i32
  }
  func.func @transform_3(%arg0: i32) -> (i32, i32) {
    %c0_i32 = arith.constant 0 : i32
    %c0_i32_0 = arith.constant 0 : i32
    %c0_i32_1 = arith.constant 0 : i32
    return %c0_i32, %c0_i32_0 : i32, i32
  }
  func.func @transform_4(%arg0: i32) -> (i32, i32) {
    %c0_i32 = arith.constant 0 : i32
    %c0_i32_0 = arith.constant 0 : i32
    %c0_i32_1 = arith.constant 0 : i32
    return %c0_i32, %c0_i32_0 : i32, i32
  }
  func.func @transform_5(%arg0: i32) -> (i32, i32, i32) {
    %c0_i32 = arith.constant 0 : i32
    %c0_i32_0 = arith.constant 0 : i32
    %c0_i32_1 = arith.constant 0 : i32
    return %arg0, %c0_i32, %c0_i32_0 : i32, i32, i32
  }
}

</mosaic_0001>

<bundles_post_ra>
// kernel: tpu_custom_call.1
= control target key start
LH: loop header
LB: loop body
LE: loop exit
PB: predicated region body
PF: predicated region fallthrough
CT: control target
= control target key end

     0   :  { %10 = vsyncpa [#allocation3], 0  ;;  %s1207_s0 = inlined_call_operand.hbm [shape: f32[2,64,256], index: 0, kind: input, shape index: {}]   ;;  %s1208_s1 = inlined_call_operand.vmem [shape: f32[64,4], index: 1, kind: input, shape index: {}]   ;;  %s1209_s2 = inlined_call_operand.vmem [shape: f32[1,4], index: 2, kind: input, shape index: {}]   ;;  %s1210_s3 = inlined_call_operand.vmem [shape: f32[4,64], index: 3, kind: input, shape index: {}]   ;;  %s1211_s4 = inlined_call_operand.vmem [shape: f32[1,64], index: 4, kind: input, shape index: {}]   ;;  %s1212_s5 = inlined_call_operand.hbm [shape: f32[2,64,256], index: 5, kind: output, shape index: {}]  }
   0x1   :  { %12 = vsyncpa [#allocation3 + $0x1], 0 }
   0x2   :  { %13 = vsyncpa [#allocation4], 0 }
   0x3   :  { %15 = vsyncpa [#allocation4 + $0x1], 0  ;;  %s921_s18 = smov 0   ;;  %s923_s19 = smov 0  }
   0x4   :  { %s925_s20 = smov 0   ;;  %s927_s21 = smov 0  }
   0x5 LB: > { %s942_s22 = sadd.s32 4294967295, %s881_s21   ;;  %s678_s23 = sadd.s32 4294967294, %s881_s21   ;;  %s881_s21 = sphi %s927_s21, %s1227_s21   ;;  %s877_s20 = sphi %s925_s20, %s1226_s20   ;;  %s873_s19 = sphi %s923_s19, %s1225_s19   ;;  %s869_s18 = sphi %s921_s18, %s1224_s18  }
   0x6   : > { %s946_s24 = sadd.s32 1, %s881_s21   ;;  %s28_s25 = sadd.s32 1, %s877_s20 }
   0x7   : > { %s25_s26 = ssub.s32 %s881_s21, %s946_s24  ;;  %p35_p0 = scmp.ne.s32.totalorder %s877_s20, %s873_s19 }
   0x8   : > { %p26_p1 = scmp.eq.s32.totalorder %s25_s26, 0  ;;  %p36_p2 = scmp.eq.s32.totalorder %s881_s21, 0 }
   0x9   : > { %p41_p3 = scmp.ne.s32.totalorder %s873_s19, %s869_s18  ;;  %p42_p4 = scmp.eq.s32.totalorder %s942_s22, 0 }
   0xa   : > { %s958_s27 = scalar_select %p26_p1, %s877_s20, %s28_s25  }
   0xb   : > { %p960_p5 = por %p36_p2, %p35_p0  ;;  %p964_p6 = por %p42_p4, %p41_p3 }
   0xc   : > { %p149_p7 = scmp.eq.s32.totalorder %s942_s22, 1  ;;  %p155_p8 = scmp.eq.s32.totalorder %s678_s23, 1 }
   0xd   : > { %s1216_s29 = scalar_select %p964_p6, 1, 0 }
   0xe   : > { %p745_p10 = scmp.lt.s32.totalorder %s881_s21, 2  ;;  %p971_p11 = por %p149_p7, %p35_p0 }
   0xf   : > { %p975_p12 = por %p155_p8, %p41_p3  ;;  %s187_s7 = sand.u32 1, %s877_s20  }
  0x10   : > { %s1217_s30 = scalar_select %p971_p11, 1, 0 }
  0x11   : > { %s1218_s6 = scalar_select %p975_p12, 1, 0 }
  0x12   : > { %s696_s8 = sshll.u32 %s881_s21, 11  ;;  %s681_s9 = sshll.u32 %s187_s7, 7 }
  0x13   : > { %s984_s12 = scalar_lea.hbm %s1207_s0, %s696_s8  ;;  %s191_s13 = scalar_lea.vmem [#allocation2], %s681_s9 }
  0x14   : > { %s198_s14 = sshll.u32 %s191_s13, 4  ;;  %p988_p13 = pnand %p745_p10, %p960_p5  ;;  %s992_s14 = int_to_ptr.vmem [resolvable:$true] %s198_s14 }
  0x15   : > { %s994_s16 = scalar_lea.sflag [#allocation3], %s187_s7  ;;  %s789_s17 = scalar_lea.hbm %s984_s12, 2048 }
  0x16   : > { %p790_p0 = scmp.ne.s32.totalorder %s984_s12, %s789_s17  ;;  %p791_p1 = pneg %p988_p13 }
  0x17   : > { %s794_s26 = scalar_lea.hbm %s1207_s0, 4096  ;;  %p795_p4 = scmp.lt.s32.totalorder %s984_s12, %s1207_s0 }
  0x18   : > { %p792_p2 = pnand %p791_p1, %p790_p0  ;;  %p796_p5 = scmp.lt.s32.totalorder %s794_s26, %s789_s17 }
  0x1a   : > { %p793_p3 = pneg %p792_p2  ;;  %p797_p7 = por %p796_p5, %p795_p4 }
  0x1c   : > { %p798_p8 = pnand %p797_p7, %p793_p3 }
  0x1e   : > { %801 = shalt.err (!%p798_p8)
}
  0x1f   : > { %s802_s7 = scalar_lea.vmem %s992_s14, 2048  ;;  %s883_s9 = smov [#allocation2]  }
  0x20   : > { %p803_p10 = scmp.ne.s32.totalorder %s992_s14, %s802_s7  ;;  %s807_s10 = sshll.u32 %s883_s9, 4  ;;  %s808_s10 = int_to_ptr.vmem [resolvable:$false] %s807_s10 }
  0x21   : > { %s809_s11 = scalar_lea.vmem %s808_s10, 4096  ;;  %p810_p2 = scmp.lt.s32.totalorder %s992_s14, %s808_s10 }
  0x22   : > { %p805_p9 = pnand %p803_p10, %p791_p1  ;;  %p811_p12 = scmp.lt.s32.totalorder %s809_s11, %s802_s7 }
  0x24   : > { %p806_p0 = pneg %p805_p9  ;;  %p812_p11 = por %p811_p12, %p810_p2 }
  0x26   : > { %p813_p6 = pnand %p812_p11, %p806_p0 }
  0x28   : > { %816 = shalt.err (!%p813_p6)
}
  0x29   : > { %s884_s13 = smov 256   ;;  %s885_s17 = smov 16  }
  0x2a   : > { %740 = dma.hbm_to_vmem [thread:$0]  (!%p988_p13), %s984_s12, 2048, %s992_s14, %s994_s16, %s884_s13, %s884_s13, %s885_s17  }
  0x2b   : > { %p684_p9 = scmp.ge.s32.totalorder %s881_s21, 1  ;;  %p206_p1 = scmp.lt.s32.totalorder %s881_s21, 3 }
  0x2d   : > { %p207_p3 = pnand %p684_p9, %p206_p1 }
  0x2e   : > { %s1018_s23 = sand.u32 (!%p207_p3), 1, %s873_s19   ;;  %p1220_p6 = scmp.ne.s32.totalorder (!%p207_p3), %s1216_s29, 0 }
  0x2f   : > { %210 = sbr.rel (%p207_p3) target bundleno = 785 (0x311), region = 40  ;;  %s685_s25 = sshll.u32 (!%p207_p3), %s1018_s23, 7 }
  0x30   : > { %s213_s26 = scalar_lea.sflag (!%p207_p3), [#allocation3], %s1018_s23  ;;  %s216_s28 = scalar_lea.vmem (!%p207_p3), [#allocation2], %s685_s25 }
  0x34   : > { %860 = dma.done.wait (%p1220_p6), %s213_s26, 2048  }
  0x35   : > { %862 = vsyncadd (%p1220_p6), %s213_s26, 4294965248  ;;  %v1028_v0 = vld [vmem:[%s216_s28] sm:$0xff]  ;;  %v1030_v1 = vld [vmem:[%s216_s28 + $0x8] sm:$0xff]  ;;  %v886_v24 = vmov 0.0   ;;  %vm887_vm0 = vmmov 0   ;;  %v309_v33 = vlaneseq  ;;  %vm320_vm1 = vcmask 130112  }
  0x36   : > { %v1032_v2 = vld [vmem:[%s216_s28 + $0x20] sm:$0xff]  ;;  %v259_v3 = vadd.f32 %v1030_v1, %v1028_v0  ;;  %v1036_v4 = vld [vmem:[%s216_s28 + $0x28] sm:$0xff]  ;;  %v1038_v5 = vld [vmem:[%s216_s28 + $0x10] sm:$0xff]  ;;  %709 = vmatprep.subr.mxu0 %v886_v24  ;;  %728 = vmatprep.subr.mxu1 %v886_v24  ;;  %vm327_vm2 = vcmask 195712   ;;  %vm334_vm3 = vcmask 261312   ;;  %vm341_vm4 = vcmask 326912  }
  0x37   : > { %v1040_v6 = vld [vmem:[%s216_s28 + $0x18] sm:$0xff]  ;;  %v265_v7 = vadd.f32 %v1036_v4, %v1032_v2  ;;  %v1044_v8 = vld [vmem:[%s216_s28 + $0x30] sm:$0xff]  ;;  %v1052_v12 = vld [vmem:[%s216_s28 + $0x40] sm:$0xff]  ;;  %725 = vmatprep.mubr.msk.f32.mxu0 %vm887_vm0, %v886_v24  ;;  %730 = vmatprep.mubr.msk.f32.mxu1 %vm887_vm0, %v886_v24  ;;  %v310_v34 = vand.u32 127, %v309_v33  ;;  %v1100_v35 = vshrl.u32 %v309_v33, 7  ;;  %vm348_vm5 = vcmask 392512  }
  0x38   : > { %v1046_v9 = vld [vmem:[%s216_s28 + $0x38] sm:$0xff]  ;;  %260 = vadd.xlane.f32.xlu0 %v259_v3  ;;  %v262_v10 = vadd.f32 %v1040_v6, %v1038_v5  ;;  %v1054_v13 = vld [vmem:[%s216_s28 + $0x48] sm:$0xff]  ;;  %v1056_v14 = vld [vmem:[%s216_s28 + $0x50] sm:$0xff]  ;;  %vm355_vm6 = vcmask 458112   ;;  %vm362_vm7 = vcmask 523712   ;;  %vm364_vm8 = vcmask 523264  }
  0x39   : > { %266 = vadd.xlane.f32.xlu1 %v265_v7  ;;  %v268_v11 = vadd.f32 %v1046_v9, %v1044_v8  ;;  %v1058_v15 = vld [vmem:[%s216_s28 + $0x58] sm:$0xff]  ;;  %v271_v16 = vadd.f32 %v1054_v13, %v1052_v12  ;;  %v1064_v18 = vld [vmem:[%s216_s28 + $0x60] sm:$0xff]  ;;  %v1066_v19 = vld [vmem:[%s216_s28 + $0x68] sm:$0xff]  ;;  %v315_v36 = vadd.s32 4294967288, %v310_v34  ;;  %v322_v38 = vadd.s32 4294967280, %v310_v34  ;;  %s1127_s10 = scalar_lea.vmem [#allocation5], %s685_s25 }
  0x3a   : > { %v274_v17 = vadd.f32 %v1058_v15, %v1056_v14  ;;  %v1068_v20 = vld [vmem:[%s216_s28 + $0x70] sm:$0xff]  ;;  %v1070_v21 = vld [vmem:[%s216_s28 + $0x78] sm:$0xff]  ;;  %v277_v22 = vadd.f32 %v1066_v19, %v1064_v18  ;;  %v297_v27 = vld [vmem:[%s1208_s1 + $0x28] sm:$0xff]  ;;  %v329_v39 = vadd.s32 4294967272, %v310_v34  ;;  %v313_v41 = vsub.s32 %v310_v34, %v1100_v35  ;;  %s697_s25 = sshll.u32 %s942_s22, 11  ;;  %s605_s11 = sshll.u32 %s1127_s10, 4  ;;  %s1160_s11 = int_to_ptr.vmem [resolvable:$true] %s605_s11 }
  0x3b   : > { %v280_v23 = vadd.f32 %v1070_v21, %v1068_v20  ;;  %v299_v25 = vld [vmem:[%s1208_s1 + $0x38] sm:$0xff]  ;;  %v298_v26 = vld [vmem:[%s1208_s1 + $0x30] sm:$0xff]  ;;  %v296_v28 = vld [vmem:[%s1208_s1 + $0x20] sm:$0xff]  ;;  %v318_v43 = vsub.s32 %v315_v36, %v1100_v35  ;;  %v336_v44 = vadd.s32 4294967264, %v310_v34  ;;  %v325_v45 = vsub.s32 %v322_v38, %v1100_v35  ;;  %s1158_s26 = scalar_lea.hbm %s1212_s5, %s697_s25  ;;  %s592_s22 = scalar_lea.sflag [#allocation4], %s1018_s23 }
  0x3c   : > { %263 = vadd.xlane.f32.xlu0 %v262_v10  ;;  %710 = vmatpush3.msra.mxu0 %v299_v25  ;;  %v295_v29 = vld [vmem:[%s1208_s1 + $0x18] sm:$0xff]  ;;  %v294_v30 = vld [vmem:[%s1208_s1 + $0x10] sm:$0xff]  ;;  %v293_v31 = vld [vmem:[%s1208_s1 + $0x8] sm:$0xff]  ;;  %v332_v48 = vsub.s32 %v329_v39, %v1100_v35  ;;  %v343_v49 = vadd.s32 4294967256, %v310_v34  ;;  %v350_v56 = vadd.s32 4294967248, %v310_v34  ;;  %v357_v61 = vadd.s32 4294967240, %v310_v34 }
  0x3d   : > { %269 = vadd.xlane.f32.xlu1 %v268_v11  ;;  %711 = vmatprep.subr.mxu0 %v886_v24  ;;  %v292_v32 = vld [vmem:[%s1208_s1] sm:$0xff]  ;;  %v339_v55 = vsub.s32 %v336_v44, %v1100_v35  ;;  %vm444_vm9 = vcmask 1043456   ;;  %vm440_vm10 = vcmask 31744   ;;  %s817_s28 = scalar_lea.vmem %s1160_s11, 2048  ;;  %p1221_p12 = scmp.ne.s32.totalorder %s1217_s30, 0 }
  0x3e   : > { %712 = vmatpush3.msra.mxu0 %v298_v26  ;;  %v346_v60 = vsub.s32 %v343_v49, %v1100_v35  ;;  %v438_v34 = vld [vmem:[%s1210_s3] sm:$0xf]  ;;  %p818_p11 = scmp.ne.s32.totalorder %s1160_s11, %s817_s28  ;;  %s888_s29 = smov [#allocation5]  }
  0x3f   : > { %713 = vmatprep.subr.mxu0 %v886_v24  ;;  %729 = vmatpush3.msk.msra.mxu1 %vm444_vm9, %v438_v34  ;;  %v300_v36 = vld [vmem:[%s1209_s2] sm:$0x1]  ;;  %s821_s12 = sshll.u32 %s888_s29, 4  ;;  %s822_s12 = int_to_ptr.vmem [resolvable:$false] %s821_s12 }
  0x40   : > { %272 = vadd.xlane.f32.xlu0 %v271_v16  ;;  %714 = vmatpush3.msra.mxu0 %v297_v27  ;;  %p819_p13 = pnand %p818_p11, %p1221_p12  ;;  %s823_s14 = scalar_lea.vmem %s822_s12, 4096 }
  0x41   : > { %275 = vadd.xlane.f32.xlu1 %v274_v17  ;;  %715 = vmatprep.subr.mxu0 %v886_v24  ;;  %v353_v17 = vsub.s32 %v350_v56, %v1100_v35  ;;  %p824_p5 = scmp.lt.s32.totalorder %s1160_s11, %s822_s12  ;;  %p825_p7 = scmp.lt.s32.totalorder %s823_s14, %s817_s28 }
  0x42   : > { %716 = vmatpush3.msra.mxu0 %v296_v28  ;;  %p820_p4 = pneg %p819_p13 }
  0x43   : > { %717 = vmatprep.subr.mxu0 %v886_v24  ;;  %p826_p8 = por %p825_p7, %p824_p5 }
  0x44   : > { %278 = vadd.xlane.f32.xlu0 %v277_v22  ;;  %718 = vmatpush3.msra.mxu0 %v295_v29 }
  0x45   : > { %281 = vadd.xlane.f32.xlu1 %v280_v23  ;;  %719 = vmatprep.subr.mxu0 %v886_v24  ;;  %p827_p10 = pnand %p826_p8, %p820_p4 }
  0x46   : > { %720 = vmatpush3.msra.mxu0 %v294_v30 }
  0x47   : > { %721 = vmatprep.subr.mxu0 %v886_v24 }
  0x48   : > { %722 = vmatpush3.msra.mxu0 %v293_v31 }
  0x49   : > { %723 = vmatprep.subr.mxu0 %v886_v24  ;;  %v360_v24 = vsub.s32 %v357_v61, %v1100_v35 }
  0x4a   : > { %724 = vmatpush3.msra.mxu0 %v292_v32 }
  0xc1   : > { %v261_v37 = vpop.xlane.xlu0 %260 }
  0xc2   : > { %v267_v40 = vpop.xlane.xlu1 %266  ;;  %v284_v42 = vmul.f32 0.00390625, %v261_v37 }
  0xc3   : > { %v286_v46 = vmul.f32 0.00390625, %v267_v40 }
  0xc4   : > { %v314_v53 = vrot.slane %v284_v42, %v313_v41  ;;  %v439_v41 = vld [vmem:[%s1211_s4] sm:$0x1] }
  0xc5   : > { %v264_v47 = vpop.xlane.xlu0 %263  ;;  %v326_v57 = vrot.slane %v286_v46, %v325_v45 }
  0xc6   : > { %v285_v50 = vmul.f32 0.00390625, %v264_v47  ;;  %v270_v51 = vpop.xlane.xlu1 %269 }
  0xc7   : > { %v287_v52 = vmul.f32 0.00390625, %v270_v51 }
  0xc8   : > { %v319_v54 = vrot.slane %v285_v50, %v318_v43 }
  0xc9   : > { %v333_v58 = vrot.slane %v287_v52, %v332_v48  ;;  %v273_v59 = vpop.xlane.xlu0 %272  ;;  %v526_v48 = vsub.s32 0, %v1100_v35 }
  0xca   : > { %v321_v62 = vsel %vm320_vm1, %v319_v54, %v314_v53  ;;  %v288_v63 = vmul.f32 0.00390625, %v273_v59  ;;  %v276_v3 = vpop.xlane.xlu1 %275 }
  0xcb   : > { %v328_v7 = vsel %vm327_vm2, %v326_v57, %v321_v62  ;;  %v289_v10 = vmul.f32 0.00390625, %v276_v3 }
  0xcc   : > { %v335_v11 = vsel %vm334_vm3, %v333_v58, %v328_v7  ;;  %v340_v16 = vrot.slane %v288_v63, %v339_v55 }
  0xcd   : > { %v347_v22 = vrot.slane %v289_v10, %v346_v60  ;;  %v279_v23 = vpop.xlane.xlu0 %278 }
  0xce   : > { %v342_v25 = vsel %vm341_vm4, %v340_v16, %v335_v11  ;;  %v290_v26 = vmul.f32 0.00390625, %v279_v23  ;;  %v282_v27 = vpop.xlane.xlu1 %281 }
  0xcf   : > { %v291_v28 = vmul.f32 0.00390625, %v282_v27  ;;  %v349_v30 = vsel %vm348_vm5, %v347_v22, %v342_v25 }
  0xd0   : > { %v354_v29 = vrot.slane %v290_v26, %v353_v17 }
  0xd1   : > { %v361_v31 = vrot.slane %v291_v28, %v360_v24 }
  0xd2   : > { %v356_v32 = vsel %vm355_vm6, %v354_v29, %v349_v30 }
  0xd3   : > { %v363_v33 = vsel %vm362_vm7, %v361_v31, %v356_v32 }
  0xd4   : > { %726 = vmatmul.mubr.msk.f32.vlgmr.msra.gmra.mxu0 %vm364_vm8, %v363_v33 }
 0x194   : > { %v433_v37 = vpop.f32.mrf.mxu0 }
 0x195   : > { %v434_v38 = vadd.f32 %v433_v37, %v300_v36 }
 0x196   : > { %v727_v39 = vpop.f32.mrf.mxu0 }
 0x197   : > { %v437_v40 = vmax.f32 %v434_v38, 0.0 }
 0x199   : > { %731 = vmatmul.mubr.msk.f32.vlgmr.msra.gmra.mxu1 %vm440_vm10, %v437_v40 }
 0x259   : > { %v514_v42 = vpop.f32.mrf.mxu1 }
 0x25a   : > { %v515_v43 = vadd.f32 %v514_v42, %v439_v41 }
 0x25b   : > { %v732_v44 = vpop.f32.mrf.mxu1 }
 0x25c   : > { %v690_v45 = vmul.f32 -1.442695, %v515_v43 }
 0x25e   : > { %785 = vpow2.f32 %v690_v45 }
 0x26b   : > { %v786_v46 = vpop.eup %785 }
 0x26c   : > { %v521_v47 = vadd.f32 1.0, %v786_v46 }
 0x26e   : > { %787 = vrcp.f32 %v521_v47 }
 0x27b   : > { %v788_v49 = vpop.eup %787 }
 0x27c   : > { %v527_v50 = vrot.slane %v788_v49, %v526_v48 }
 0x27e   : > { %533 = vbcast.lane.b32.xlu1 %v527_v50, 264  ;;  %529 = vbcast.lane.b32.xlu0 %v527_v50, 256 }
 0x282   : > { %537 = vbcast.lane.b32.xlu1 %v527_v50, 272  ;;  %545 = vbcast.lane.b32.xlu0 %v527_v50, 288 }
 0x286   : > { %541 = vbcast.lane.b32.xlu1 %v527_v50, 280  ;;  %553 = vbcast.lane.b32.xlu0 %v527_v50, 304 }
 0x28a   : > { %549 = vbcast.lane.b32.xlu1 %v527_v50, 296 }
 0x28e   : > { %557 = vbcast.lane.b32.xlu1 %v527_v50, 312 }
 0x2f0   : > { %v534_v51 = vpop.permute.xlu1 %533  ;;  %v530_v52 = vpop.permute.xlu0 %529 }
 0x2f1   : > { %v561_v53 = vmul.f32 %v534_v51, %v1038_v5  ;;  %v562_v54 = vmul.f32 %v534_v51, %v1040_v6  ;;  %v559_v55 = vmul.f32 %v530_v52, %v1028_v0  ;;  %v560_v35 = vmul.f32 %v530_v52, %v1030_v1 }
 0x2f3   : > { %577 = vst [vmem:[%s1127_s10 + $0x10] sm:$0xff] %v561_v53  ;;  %578 = vst [vmem:[%s1127_s10 + $0x18] sm:$0xff] %v562_v54 }
 0x2f4   : > { %575 = vst [vmem:[%s1127_s10] sm:$0xff] %v559_v55  ;;  %576 = vst [vmem:[%s1127_s10 + $0x8] sm:$0xff] %v560_v35  ;;  %v538_v5 = vpop.permute.xlu1 %537  ;;  %v546_v0 = vpop.permute.xlu0 %545 }
 0x2f5   : > { %v563_v1 = vmul.f32 %v538_v5, %v1032_v2  ;;  %v564_v6 = vmul.f32 %v538_v5, %v1036_v4  ;;  %v567_v56 = vmul.f32 %v546_v0, %v1052_v12  ;;  %v568_v57 = vmul.f32 %v546_v0, %v1054_v13 }
 0x2f7   : > { %579 = vst [vmem:[%s1127_s10 + $0x20] sm:$0xff] %v563_v1  ;;  %580 = vst [vmem:[%s1127_s10 + $0x28] sm:$0xff] %v564_v6 }
 0x2f8   : > { %583 = vst [vmem:[%s1127_s10 + $0x40] sm:$0xff] %v567_v56  ;;  %584 = vst [vmem:[%s1127_s10 + $0x48] sm:$0xff] %v568_v57  ;;  %v542_v58 = vpop.permute.xlu1 %541  ;;  %v554_v59 = vpop.permute.xlu0 %553 }
 0x2f9   : > { %v565_v2 = vmul.f32 %v542_v58, %v1044_v8  ;;  %v566_v60 = vmul.f32 %v542_v58, %v1046_v9  ;;  %v571_v4 = vmul.f32 %v554_v59, %v1064_v18  ;;  %v572_v12 = vmul.f32 %v554_v59, %v1066_v19 }
 0x2fb   : > { %581 = vst [vmem:[%s1127_s10 + $0x30] sm:$0xff] %v565_v2  ;;  %582 = vst [vmem:[%s1127_s10 + $0x38] sm:$0xff] %v566_v60 }
 0x2fc   : > { %587 = vst [vmem:[%s1127_s10 + $0x60] sm:$0xff] %v571_v4  ;;  %588 = vst [vmem:[%s1127_s10 + $0x68] sm:$0xff] %v572_v12  ;;  %v550_v13 = vpop.permute.xlu1 %549 }
 0x2fd   : > { %v569_v61 = vmul.f32 %v550_v13, %v1056_v14  ;;  %v570_v62 = vmul.f32 %v550_v13, %v1058_v15 }
 0x2ff   : > { %585 = vst [vmem:[%s1127_s10 + $0x50] sm:$0xff] %v569_v61  ;;  %586 = vst [vmem:[%s1127_s10 + $0x58] sm:$0xff] %v570_v62 }
 0x300   : > { %v558_v8 = vpop.permute.xlu1 %557 }
 0x301   : > { %v573_v9 = vmul.f32 %v558_v8, %v1068_v20  ;;  %v574_v14 = vmul.f32 %v558_v8, %v1070_v21 }
 0x303   : > { %589 = vst [vmem:[%s1127_s10 + $0x70] sm:$0xff] %v573_v9  ;;  %590 = vst [vmem:[%s1127_s10 + $0x78] sm:$0xff] %v574_v14 }
 0x304   : > { %830 = shalt.err (!%p827_p10)
}
 0x305   : > { %s831_s15 = scalar_lea.hbm %s1158_s26, 2048  ;;  %s835_s7 = scalar_lea.hbm %s1212_s5, 4096 }
 0x306   : > { %p832_p0 = scmp.ne.s32.totalorder %s1158_s26, %s831_s15  ;;  %p836_p1 = scmp.lt.s32.totalorder %s1158_s26, %s1212_s5 }
 0x307   : > { %p837_p3 = scmp.lt.s32.totalorder %s835_s7, %s831_s15 }
 0x308   : > { %p833_p2 = pnand %p832_p0, %p1221_p12 }
 0x309   : > { %p838_p6 = por %p837_p3, %p836_p1 }
 0x30a   : > { %p834_p9 = pneg %p833_p2 }
 0x30c   : > { %p839_p11 = pnand %p838_p6, %p834_p9 }
 0x30e   : > { %842 = shalt.err (!%p839_p11)
}
 0x30f   : > { %s889_s25 = smov 256   ;;  %s890_s13 = smov 16  }
 0x310   : > { %735 = dma.vmem_to_hbm [thread:$0]  (%p1221_p12), %s1160_s11, 2048, %s1158_s26, %s592_s22, %s889_s25, %s889_s25, %s890_s13  }
 0x311 PF: > { %s620_s17 = sand.u32 1, %s869_s18   ;;  %p1222_p13 = scmp.ne.s32.totalorder %s1218_s6, 0 }
 0x312   : > { %p1223_p4 = scmp.ge.s32.totalorder %s881_s21, 2  ;;  %s621_s28 = scalar_lea.sflag [#allocation4], %s620_s17 }
 0x314   : > { %p742_p5 = pnand %p1223_p4, %p1222_p13 }
 0x316   : > { %p743_p7 = pneg %p742_p5 }
 0x318   : > { %864 = dma.done.wait (%p743_p7), %s621_s28, 2048  }
 0x319   : > { %866 = vsyncadd (%p743_p7), %s621_s28, 4294965248  ;;  %p18_p8 = scmp.ge.s32.totalorder %s946_s24, 4   ;;  %s1224_s18 = smov %s873_s19 }
 0x31a   : > { %s1225_s19 = smov %s877_s20  ;;  %s1226_s20 = smov %s958_s27 }
 0x31b   : > { %s1227_s21 = smov %s946_s24  ;;  %20 = sbr.rel (!%p18_p8) target bundleno = 5 (0x5), region = 85 }
 0x320   :  { %626 = vsyncpa [#allocation3], 1 }
 0x321   :  { %628 = vsyncpa [#allocation3 + $0x1], 1 }
 0x322   :  { %629 = vsyncpa [#allocation4], 1 }
 0x323   :  { %631 = vsyncpa [#allocation4 + $0x1], 1 }

</bundles_post_ra>
